<compile_context>
chip_gen: v6e
topology: v6e:2x2x1
jax: 0.10.0
libtpu: 0.0.40
codegen_flags: <defaults>
</compile_context>

<pallas_src>
import functools

import numpy as np
import jax
import jax.numpy as jnp
from jax import lax
from jax.experimental import pallas as pl
from jax.experimental.pallas import tpu as pltpu

EPS = 1e-5
NEG_SLOPE = 0.01


# ----------------------------------------------------------------------------
# Pallas kernels
# ----------------------------------------------------------------------------
def conv3x3_kernel(fuse_act, x_ref, w_ref, b_ref, scale_ref, shift_ref,
                   y_ref, rs_ref, rq_ref):
    """Nb images per grid step, lane-dense row layout, one MXU matmul.

    x_ref:     (Nb, H, W*Cin)   f32 unpadded input rows (lane = x*Cin + ci)
    w_ref:     (3*W*Cin, W*Cout) bf16 banded weight (ky taps + column halo folded in)
    b_ref:     (1, W*Cout)      f32 bias, tiled per lane
    scale_ref: (1, W*Cin)       f32 per-lane scale (fused BN of the previous layer)
    shift_ref: (1, W*Cin)       f32 per-lane shift
    y_ref:     (Nb, H, W*Cout)  conv output (pre-BN, bias included)
    rs_ref:    (1, 1, W*Cout)   per-step partial sum of the PRE-bias conv output
    rq_ref:    (1, 1, W*Cout)   per-step partial sum of squares (pre-bias)
    """
    Nb, H, Lin = x_ref.shape
    rows = lax.broadcasted_iota(jnp.int32, (H, Lin), 0)

    slabs = []
    for nb in range(Nb):
        x = x_ref[nb]                                    # (H, W*Cin) f32
        if fuse_act:
            # Fused BN + LeakyReLU of the previous layer, applied BEFORE the halo is
            # built so the masked halo rows stay exactly zero (matches PyTorch's zero
            # padding of the post-activation tensor).  Kept in f32 (no bf16 VPU on v5e).
            x = x * scale_ref[...] + shift_ref[...]
            x = jnp.where(x > 0, x, NEG_SLOPE * x)
        # Row halo via XLU rolls + iota mask (no pad scratch, no unaligned sublane stores).
        x_up = jnp.where(rows == 0, 0.0, pltpu.roll(x, shift=1, axis=0))       # x[y-1]
        x_dn = jnp.where(rows == H - 1, 0.0, pltpu.roll(x, shift=H - 1, axis=0))  # x[y+1]
        slabs.append(jnp.concatenate([x_up, x, x_dn], axis=1))                 # (H, 3*Lin)

    xs = slabs[0] if Nb == 1 else jnp.concatenate(slabs, axis=0)               # (Nb*H, 3*Lin)

    # Single MXU matmul: M=Nb*H, K=3*W*Cin, N=W*Cout. bf16 operands, f32 accumulation.
    acc = jnp.dot(xs.astype(jnp.bfloat16), w_ref[...],
                  preferred_element_type=jnp.float32)                          # (Nb*H, Lout)

    # Batch statistics from the f32 accumulator, PRE-bias (bias added back in fold_bn)
    # to avoid catastrophic cancellation in E[x^2] - E[x]^2 for large offsets.
    rs_ref[0] = jnp.sum(acc, axis=0, keepdims=True)
    rq_ref[0] = jnp.sum(acc * acc, axis=0, keepdims=True)

    acc = acc + b_ref[...]
    for nb in range(Nb):                                                       # aligned stores
        y_ref[nb] = acc[nb * H:(nb + 1) * H, :]


def bn_lrelu_kernel(y_ref, scale_ref, shift_ref, o_ref):
    """Folded BatchNorm (y*scale + shift) followed by LeakyReLU(0.01), lane-dense slab."""
    z = y_ref[...] * scale_ref[...] + shift_ref[...]
    o_ref[...] = jnp.where(z > 0, z, NEG_SLOPE * z)


# ----------------------------------------------------------------------------
# Pallas wrappers
# ----------------------------------------------------------------------------
def _pick_images_per_step(N, H):
    """Stack images per grid step so M = Nb*H approaches ~128, but keep >= 2 steps."""
    nb = min(N, max(1, 128 // H))
    while N % nb != 0:
        nb -= 1
    if N >= 2 and N // nb < 2:        # keep >= 2 parallel steps for v7x megacore
        nb = max(1, N // 2)
        while N % nb != 0:
            nb -= 1
    return nb


def conv3x3_rowdense(x_rows, w_flat, b_row, scale_row, shift_row, *, fuse_act):
    """x_rows: (N, H, W*Cin) f32; w_flat: (3*W*Cin, W*Cout) bf16."""
    N, H, Lin = x_rows.shape
    Lout = w_flat.shape[-1]
    nb = _pick_images_per_step(N, H)
    steps = N // nb
    kernel = functools.partial(conv3x3_kernel, fuse_act)

    flops = 2 * N * H * (3 * Lin) * Lout
    bytes_accessed = (N * H * Lin * 4 + 3 * Lin * Lout * 2 + 3 * Lout * 4
                      + N * H * Lout * 4 + 2 * steps * Lout * 4)

    y, rs, rq = pl.pallas_call(
        kernel,
        out_shape=(
            jax.ShapeDtypeStruct((N, H, Lout), jnp.float32),
            jax.ShapeDtypeStruct((steps, 1, Lout), jnp.float32),
            jax.ShapeDtypeStruct((steps, 1, Lout), jnp.float32),
        ),
        grid_spec=pltpu.PrefetchScalarGridSpec(
            num_scalar_prefetch=0,
            grid=(steps,),
            in_specs=[
                pl.BlockSpec((nb, H, Lin), lambda n: (n, 0, 0)),
                pl.BlockSpec((3 * Lin, Lout), lambda n: (0, 0)),
                pl.BlockSpec((1, Lout), lambda n: (0, 0)),
                pl.BlockSpec((1, Lin), lambda n: (0, 0)),
                pl.BlockSpec((1, Lin), lambda n: (0, 0)),
            ],
            out_specs=[
                pl.BlockSpec((nb, H, Lout), lambda n: (n, 0, 0)),
                pl.BlockSpec((1, 1, Lout), lambda n: (n, 0, 0)),
                pl.BlockSpec((1, 1, Lout), lambda n: (n, 0, 0)),
            ],
        ),
        # No resident accumulator (stats are per-step partials) -> batch axis is parallel.
        compiler_params=pltpu.CompilerParams(dimension_semantics=("parallel",)),
        cost_estimate=pl.CostEstimate(flops=flops, transcendentals=0,
                                      bytes_accessed=bytes_accessed),
    )(x_rows, w_flat, b_row, scale_row, shift_row)
    return y, rs, rq


def _pick_block_rows(R):
    """Big lane-dense blocks (target <= 512 rows) while keeping >= 2 grid steps."""
    if R % 8 != 0:
        return R
    target = min(R, 512)
    if R >= 16:
        target = min(target, R // 2)
    br = max(8, (target // 8) * 8)
    while br > 8 and R % br != 0:
        br -= 8
    return br


def bn_lrelu_rows(y_rows, scale_row, shift_row):
    """y_rows: (R, L) lane-dense slab; scale/shift: (1, L)."""
    R, L = y_rows.shape
    br = _pick_block_rows(R)
    return pl.pallas_call(
        bn_lrelu_kernel,
        out_shape=jax.ShapeDtypeStruct((R, L), jnp.float32),
        grid_spec=pltpu.PrefetchScalarGridSpec(
            num_scalar_prefetch=0,
            grid=(R // br,),
            in_specs=[
                pl.BlockSpec((br, L), lambda r: (r, 0)),
                pl.BlockSpec((1, L), lambda r: (0, 0)),
                pl.BlockSpec((1, L), lambda r: (0, 0)),
            ],
            out_specs=pl.BlockSpec((br, L), lambda r: (r, 0)),
        ),
        compiler_params=pltpu.CompilerParams(dimension_semantics=("parallel",)),
        cost_estimate=pl.CostEstimate(flops=3 * R * L, transcendentals=0,
                                      bytes_accessed=2 * R * L * 4 + 2 * L * 4),
    )(y_rows, scale_row, shift_row)


# ----------------------------------------------------------------------------
# Glue (plain JAX / numpy): upsample, banded-weight construction, BN folding
# ----------------------------------------------------------------------------
def _interp_matrix(out_size, in_size):
    """Static align_corners=True bilinear interpolation matrix (out_size, in_size)."""
    R = np.zeros((out_size, in_size), np.float32)
    if out_size == 1 or in_size == 1:
        R[:, 0] = 1.0
        return R
    scale = (in_size - 1) / (out_size - 1)
    for o in range(out_size):
        pos = o * scale
        i0 = int(np.floor(pos))
        i1 = min(i0 + 1, in_size - 1)
        t = pos - i0
        R[o, i0] += 1.0 - t
        R[o, i1] += t
    return R


def upsample_bilinear_matrices(x_nhwc, out_h, out_w):
    """Separable align_corners bilinear upsample as two dense einsums (constants folded)."""
    _, H, W, _ = x_nhwc.shape
    Rh = jnp.asarray(_interp_matrix(out_h, H))
    Rw = jnp.asarray(_interp_matrix(out_w, W))
    y = jnp.einsum('oh,nhwc->nowc', Rh, x_nhwc)
    return jnp.einsum('pw,nowc->nopc', Rw, y)


def upsample_bilinear_align_corners(x_nhwc, out_h, out_w):
    """Gather/lerp implementation kept for the independent reference."""
    N, H, W, C = x_nhwc.shape
    hs = (jnp.arange(out_h, dtype=jnp.float32) * (H - 1) / (out_h - 1)
          if out_h > 1 else jnp.zeros((out_h,), jnp.float32))
    ws = (jnp.arange(out_w, dtype=jnp.float32) * (W - 1) / (out_w - 1)
          if out_w > 1 else jnp.zeros((out_w,), jnp.float32))
    h0 = jnp.floor(hs).astype(jnp.int32); h1 = jnp.minimum(h0 + 1, H - 1)
    w0 = jnp.floor(ws).astype(jnp.int32); w1 = jnp.minimum(w0 + 1, W - 1)
    th = (hs - h0.astype(jnp.float32))[None, :, None, None]
    tw = (ws - w0.astype(jnp.float32))[None, None, :, None]
    x00 = x_nhwc[:, h0][:, :, w0]; x01 = x_nhwc[:, h0][:, :, w1]
    x10 = x_nhwc[:, h1][:, :, w0]; x11 = x_nhwc[:, h1][:, :, w1]
    top = x00 * (1.0 - tw) + x01 * tw
    bot = x10 * (1.0 - tw) + x11 * tw
    return top * (1.0 - th) + bot * th


def _band_matrix(W):
    """Static B[x, kx, p] = 1 iff p == x + kx - 1 (in range); folds kx taps + column halo."""
    B = np.zeros((W, 3, W), np.float32)
    for x in range(W):
        for kx in range(3):
            p = x + kx - 1
            if 0 <= p < W:
                B[x, kx, p] = 1.0
    return B


def make_banded_weight(w9, W):
    """w9: (9, Cin, Cout) tap-major (ky*3+kx) -> banded (3, W*Cin, W*Cout)."""
    _, Cin, Cout = w9.shape
    wk = w9.reshape(3, 3, Cin, Cout)                       # (ky, kx, ci, co)
    B = jnp.asarray(_band_matrix(W))                       # (x, kx, p)
    Wb = jnp.einsum('xkp,ykio->ypixo', B, wk)              # (ky, p, ci, x, co)
    return Wb.reshape(3, W * Cin, W * Cout)


def _tile_row(vec, W):
    return jnp.tile(vec, W)[None, :]          # (1, W*C), lane = x*C + c


def prepare_params(params, W):
    """Hoisted, once-per-model parameter prep (banded bf16 weights, lane-tiled rows)."""
    Cin1 = params["w1"].shape[1]
    Cout1 = params["w1"].shape[2]
    Cout2 = params["w2"].shape[2]
    w1b = make_banded_weight(params["w1"], W).reshape(3 * W * Cin1, W * Cout1)
    w2b = make_banded_weight(params["w2"], W).reshape(3 * W * Cout1, W * Cout2)
    return dict(
        w1b=w1b.astype(jnp.bfloat16), w2b=w2b.astype(jnp.bfloat16),
        b1_row=_tile_row(params["b1"], W), b2_row=_tile_row(params["b2"], W),
        ones_in1=jnp.ones((1, W * Cin1), jnp.float32),
        zeros_in1=jnp.zeros((1, W * Cin1), jnp.float32),
        b1=params["b1"], b2=params["b2"],
        g1=params["g1"], be1=params["be1"],
        g2=params["g2"], be2=params["be2"],
    )


def fold_bn(sum_c, sq_c, count, bias, gamma, beta):
    """Training-mode BN fold from PRE-bias f32 partial sums (shift-robust variance)."""
    mean_nb = sum_c / count
    var = sq_c / count - mean_nb * mean_nb     # biased variance, bias-free accumulation
    mean = mean_nb + bias
    inv = gamma / jnp.sqrt(var + EPS)
    return inv, beta - mean * inv              # scale, shift


@jax.jit
def upsample_bn_forward(x_nchw, concat_nchw, prep):
    """Matches UpSampleBN.forward (training-mode BatchNorm, LeakyReLU slope 0.01)."""
    x = jnp.transpose(x_nchw, (0, 2, 3, 1))               # NCHW -> NHWC
    cw = jnp.transpose(concat_nchw, (0, 2, 3, 1))
    up = upsample_bilinear_matrices(x, cw.shape[1], cw.shape[2])
    f = jnp.concatenate([up, cw], axis=-1)                 # (N, H, W, Cin1)

    N, H, W, Cin1 = f.shape
    Cout1 = prep["b1"].shape[0]
    Cout2 = prep["b2"].shape[0]
    count = float(N * H * W)

    f_rows = f.reshape(N, H, W * Cin1)                     # lane-dense row layout

    # ---- conv1 (+ pre-bias batch stats) ----
    y1, rs1, rq1 = conv3x3_rowdense(f_rows, prep["w1b"], prep["b1_row"],
                                    prep["ones_in1"], prep["zeros_in1"],
                                    fuse_act=False)
    sum1 = rs1.reshape(-1, W, Cout1).sum(axis=(0, 1))
    sq1 = rq1.reshape(-1, W, Cout1).sum(axis=(0, 1))
    scale1, shift1 = fold_bn(sum1, sq1, count, prep["b1"], prep["g1"], prep["be1"])

    # ---- conv2 with BN1 + LeakyReLU fused into its input path (+ batch stats) ----
    y2, rs2, rq2 = conv3x3_rowdense(y1, prep["w2b"], prep["b2_row"],
                                    _tile_row(scale1, W), _tile_row(shift1, W),
                                    fuse_act=True)
    sum2 = rs2.reshape(-1, W, Cout2).sum(axis=(0, 1))
    sq2 = rq2.reshape(-1, W, Cout2).sum(axis=(0, 1))
    scale2, shift2 = fold_bn(sum2, sq2, count, prep["b2"], prep["g2"], prep["be2"])

    # ---- final BN2 + LeakyReLU on a lane-dense slab ----
    out_rows = bn_lrelu_rows(y2.reshape(N * H, W * Cout2),
                             _tile_row(scale2, W), _tile_row(shift2, W))
    out = out_rows.reshape(N, H, W, Cout2)
    return jnp.transpose(out, (0, 3, 1, 2))                # NHWC -> NCHW


# ----------------------------------------------------------------------------
# Pure-JAX reference (for verification, f32 everywhere)
# ----------------------------------------------------------------------------
def reference_forward(x_nchw, concat_nchw, params):
    x = jnp.transpose(x_nchw, (0, 2, 3, 1))
    cw = jnp.transpose(concat_nchw, (0, 2, 3, 1))
    up = upsample_bilinear_align_corners(x, cw.shape[1], cw.shape[2])
    f = jnp.concatenate([up, cw], axis=-1)

    def block(h, w9, b, gamma, beta):
        cin = h.shape[-1]
        w_hwio = w9.reshape(3, 3, cin, -1)
        y = lax.conv_general_dilated(
            h, w_hwio, window_strides=(1, 1), padding="SAME",
            dimension_numbers=("NHWC", "HWIO", "NHWC")) + b
        mean = y.mean(axis=(0, 1, 2))
        var = y.var(axis=(0, 1, 2))
        z = (y - mean) / jnp.sqrt(var + EPS) * gamma + beta
        return jnp.where(z > 0, z, NEG_SLOPE * z)

    h = block(f, params["w1"], params["b1"], params["g1"], params["be1"])
    h = block(h, params["w2"], params["b2"], params["g2"], params["be2"])
    return jnp.transpose(h, (0, 3, 1, 2))


# ----------------------------------------------------------------------------
# Main
# ----------------------------------------------------------------------------
if __name__ == "__main__":
    key = jax.random.PRNGKey(0)
    k_x, k_c, k_w1, k_b1, k_w2, k_b2 = jax.random.split(key, 6)

    # small shapes: x is the low-res feature map, concat_with the skip feature map
    N, Cx, Hx, Wx = 2, 4, 8, 8
    Cc, Hc, Wc = 4, 16, 16
    skip_input = Cx + Cc          # 8
    output_features = 8

    x = jax.random.normal(k_x, (N, Cx, Hx, Wx), jnp.float32)
    concat_with = jax.random.normal(k_c, (N, Cc, Hc, Wc), jnp.float32)

    # deterministic synthetic parameters (PyTorch Conv2d weight layout OIHW -> tap-major (9,I,O))
    def make_conv(k, cin, cout):
        kw, kb = jax.random.split(k)
        w_oihw = 0.1 * jax.random.normal(kw, (cout, cin, 3, 3), jnp.float32)
        b = 0.05 * jax.random.normal(kb, (cout,), jnp.float32)
        w9 = jnp.transpose(w_oihw, (2, 3, 1, 0)).reshape(9, cin, cout)
        return w9, b

    w1, b1 = make_conv(k_w1, skip_input, output_features)
    w2, b2 = make_conv(k_w2, output_features, output_features)
    params = dict(
        w1=w1, b1=b1, g1=jnp.ones((output_features,), jnp.float32),
        be1=jnp.zeros((output_features,), jnp.float32),
        w2=w2, b2=b2, g2=jnp.ones((output_features,), jnp.float32),
        be2=jnp.zeros((output_features,), jnp.float32),
    )

    prep = prepare_params(params, Wc)   # hoisted out of the per-forward hot path

    out = upsample_bn_forward(x, concat_with, prep)
    out = jax.block_until_ready(out)
    assert out.shape == (N, output_features, Hc, Wc), out.shape

    ref = jax.block_until_ready(reference_forward(x, concat_with, params))
    # bf16 MXU operands (f32 accumulation) vs the f32 reference -> loosened tolerance.
    assert jnp.allclose(out, ref, rtol=5e-2, atol=5e-2), (
        float(jnp.max(jnp.abs(out - ref))))

    print("KERNEL_OK")
</pallas_src>

<mosaic_0001>
module attributes {stable_mosaic.version = 11 : i64} {
  func.func @conv3x3_kernel(%arg0: i32, %arg1: memref<1x16x128xf32, #tpu.memory_space<vmem>>, %arg2: memref<384x128xbf16, #tpu.memory_space<vmem>>, %arg3: memref<1x128xf32, #tpu.memory_space<vmem>>, %arg4: memref<1x128xf32, #tpu.memory_space<vmem>>, %arg5: memref<1x128xf32, #tpu.memory_space<vmem>>, %arg6: memref<1x16x128xf32, #tpu.memory_space<vmem>>, %arg7: memref<1x1x128xf32, #tpu.memory_space<vmem>>, %arg8: memref<1x1x128xf32, #tpu.memory_space<vmem>>) attributes {dimension_semantics = [#tpu.dimension_semantics<parallel>], iteration_bounds = array<i64: 2>, scalar_prefetch = 0 : i64, scratch_operands = 0 : i64, tpu.core_type = #tpu.core_type<tc>, window_params = [{transform_indices = @transform_0, window_bounds = array<i64: 1, 16, 128>}, {pipeline_mode = #tpu.pipeline_mode<synchronous>, transform_indices = @transform_1, window_bounds = array<i64: 384, 128>}, {pipeline_mode = #tpu.pipeline_mode<synchronous>, transform_indices = @transform_2, window_bounds = array<i64: 1, 128>}, {pipeline_mode = #tpu.pipeline_mode<synchronous>, transform_indices = @transform_3, window_bounds = array<i64: 1, 128>}, {pipeline_mode = #tpu.pipeline_mode<synchronous>, transform_indices = @transform_4, window_bounds = array<i64: 1, 128>}, {transform_indices = @transform_5, window_bounds = array<i64: 1, 16, 128>}, {transform_indices = @transform_6, window_bounds = array<i64: 1, 1, 128>}, {transform_indices = @transform_7, window_bounds = array<i64: 1, 1, 128>}]} {
    %0 = tpu.iota {dimensions = array<i32: 0>} : vector<16x128xi32>
    %c0 = arith.constant 0 : index
    %c0_0 = arith.constant 0 : index
    %c0_1 = arith.constant 0 : index
    %1 = vector.load %arg1[%c0, %c0_0, %c0_1] : memref<1x16x128xf32, #tpu.memory_space<vmem>>, vector<1x16x128xf32>
    %2 = vector.shape_cast %1 : vector<1x16x128xf32> to vector<16x128xf32>
    %c0_i32 = arith.constant 0 : i32
    %3 = vector.broadcast %c0_i32 : i32 to vector<16x128xi32>
    %4 = arith.cmpi eq, %0, %3 : vector<16x128xi32>
    %c1_i32 = arith.constant 1 : i32
    %5 = tpu.dynamic_rotate %2 by %c1_i32 dim 0 : vector<16x128xf32>, i32 -> vector<16x128xf32>
    %cst = arith.constant 0.000000e+00 : f32
    %6 = vector.broadcast %cst : f32 to vector<16x128xf32>
    %7 = arith.select %4, %6, %5 : vector<16x128xi1>, vector<16x128xf32>
    %c15_i32 = arith.constant 15 : i32
    %8 = vector.broadcast %c15_i32 : i32 to vector<16x128xi32>
    %9 = arith.cmpi eq, %0, %8 : vector<16x128xi32>
    %c15_i32_2 = arith.constant 15 : i32
    %10 = tpu.dynamic_rotate %2 by %c15_i32_2 dim 0 : vector<16x128xf32>, i32 -> vector<16x128xf32>
    %cst_3 = arith.constant 0.000000e+00 : f32
    %11 = vector.broadcast %cst_3 : f32 to vector<16x128xf32>
    %12 = arith.select %9, %11, %10 : vector<16x128xi1>, vector<16x128xf32>
    %13 = tpu.concatenate %7, %2, %12 in 1 : vector<16x128xf32>, vector<16x128xf32>, vector<16x128xf32> -> vector<16x384xf32>
    %14 = arith.truncf %13 : vector<16x384xf32> to vector<16x384xbf16>
    %c0_4 = arith.constant 0 : index
    %c0_5 = arith.constant 0 : index
    %15 = vector.load %arg2[%c0_4, %c0_5] : memref<384x128xbf16, #tpu.memory_space<vmem>>, vector<384x128xbf16>
    %cst_6 = arith.constant dense<0.000000e+00> : vector<16x128xf32>
    %16 = tpu.matmul %14, %15, %cst_6 {dimension_numbers = #tpu.dot_dimension_numbers<[1], [0], [0], [1], [0, 0, 1, 1], [], []>} : vector<16x384xbf16>, vector<384x128xbf16>, vector<16x128xf32> -> vector<16x128xf32>
    %cst_7 = arith.constant dense<0.000000e+00> : vector<128xf32>
    %17 = vector.multi_reduction <add>, %16, %cst_7 [0] : vector<16x128xf32> to vector<128xf32>
    %18 = vector.shape_cast %17 : vector<128xf32> to vector<1x128xf32>
    %c0_8 = arith.constant 0 : index
    %c0_9 = arith.constant 0 : index
    %c0_10 = arith.constant 0 : index
    %19 = vector.load %arg7[%c0_8, %c0_9, %c0_10] : memref<1x1x128xf32, #tpu.memory_space<vmem>>, vector<1x1x128xf32>
    %20 = vector.shape_cast %19 : vector<1x1x128xf32> to vector<1x128xf32>
    %21 = vector.shape_cast %18 : vector<1x128xf32> to vector<1x1x128xf32>
    tpu.vector_store %arg7[%c0_8, %c0_9, %c0_10], %21 {strides = array<i32>} : memref<1x1x128xf32, #tpu.memory_space<vmem>>, vector<1x1x128xf32>,
    %22 = arith.mulf %16, %16 : vector<16x128xf32>
    %cst_11 = arith.constant dense<0.000000e+00> : vector<128xf32>
    %23 = vector.multi_reduction <add>, %22, %cst_11 [0] : vector<16x128xf32> to vector<128xf32>
    %24 = vector.shape_cast %23 : vector<128xf32> to vector<1x128xf32>
    %c0_12 = arith.constant 0 : index
    %c0_13 = arith.constant 0 : index
    %c0_14 = arith.constant 0 : index
    %25 = vector.load %arg8[%c0_12, %c0_13, %c0_14] : memref<1x1x128xf32, #tpu.memory_space<vmem>>, vector<1x1x128xf32>
    %26 = vector.shape_cast %25 : vector<1x1x128xf32> to vector<1x128xf32>
    %27 = vector.shape_cast %24 : vector<1x128xf32> to vector<1x1x128xf32>
    tpu.vector_store %arg8[%c0_12, %c0_13, %c0_14], %27 {strides = array<i32>} : memref<1x1x128xf32, #tpu.memory_space<vmem>>, vector<1x1x128xf32>,
    %c0_15 = arith.constant 0 : index
    %c0_16 = arith.constant 0 : index
    %28 = vector.load %arg3[%c0_15, %c0_16] : memref<1x128xf32, #tpu.memory_space<vmem>>, vector<1x128xf32>
    %29 = vector.broadcast %28 : vector<1x128xf32> to vector<16x128xf32>
    %30 = arith.addf %16, %29 : vector<16x128xf32>
    %c0_17 = arith.constant 0 : index
    %c0_18 = arith.constant 0 : index
    %c0_19 = arith.constant 0 : index
    %31 = vector.load %arg6[%c0_17, %c0_18, %c0_19] : memref<1x16x128xf32, #tpu.memory_space<vmem>>, vector<1x16x128xf32>
    %32 = vector.shape_cast %31 : vector<1x16x128xf32> to vector<16x128xf32>
    %33 = vector.shape_cast %30 : vector<16x128xf32> to vector<1x16x128xf32>
    tpu.vector_store %arg6[%c0_17, %c0_18, %c0_19], %33 {strides = array<i32>} : memref<1x16x128xf32, #tpu.memory_space<vmem>>, vector<1x16x128xf32>,
    return
  }
  func.func @transform_0(%arg0: i32) -> (i32, i32, i32) {
    %c0_i32 = arith.constant 0 : i32
    %c0_i32_0 = arith.constant 0 : i32
    %c0_i32_1 = arith.constant 0 : i32
    return %arg0, %c0_i32, %c0_i32_0 : i32, i32, i32
  }
  func.func @transform_1(%arg0: i32) -> (i32, i32) {
    %c0_i32 = arith.constant 0 : i32
    %c0_i32_0 = arith.constant 0 : i32
    %c0_i32_1 = arith.constant 0 : i32
    return %c0_i32, %c0_i32_0 : i32, i32
  }
  func.func @transform_2(%arg0: i32) -> (i32, i32) {
    %c0_i32 = arith.constant 0 : i32
    %c0_i32_0 = arith.constant 0 : i32
    %c0_i32_1 = arith.constant 0 : i32
    return %c0_i32, %c0_i32_0 : i32, i32
  }
  func.func @transform_3(%arg0: i32) -> (i32, i32) {
    %c0_i32 = arith.constant 0 : i32
    %c0_i32_0 = arith.constant 0 : i32
    %c0_i32_1 = arith.constant 0 : i32
    return %c0_i32, %c0_i32_0 : i32, i32
  }
  func.func @transform_4(%arg0: i32) -> (i32, i32) {
    %c0_i32 = arith.constant 0 : i32
    %c0_i32_0 = arith.constant 0 : i32
    %c0_i32_1 = arith.constant 0 : i32
    return %c0_i32, %c0_i32_0 : i32, i32
  }
  func.func @transform_5(%arg0: i32) -> (i32, i32, i32) {
    %c0_i32 = arith.constant 0 : i32
    %c0_i32_0 = arith.constant 0 : i32
    %c0_i32_1 = arith.constant 0 : i32
    return %arg0, %c0_i32, %c0_i32_0 : i32, i32, i32
  }
  func.func @transform_6(%arg0: i32) -> (i32, i32, i32) {
    %c0_i32 = arith.constant 0 : i32
    %c0_i32_0 = arith.constant 0 : i32
    %c0_i32_1 = arith.constant 0 : i32
    return %arg0, %c0_i32, %c0_i32_0 : i32, i32, i32
  }
  func.func @transform_7(%arg0: i32) -> (i32, i32, i32) {
    %c0_i32 = arith.constant 0 : i32
    %c0_i32_0 = arith.constant 0 : i32
    %c0_i32_1 = arith.constant 0 : i32
    return %arg0, %c0_i32, %c0_i32_0 : i32, i32, i32
  }
}

module attributes {stable_mosaic.version = 11 : i64} {
  func.func @bn_lrelu_kernel(%arg0: i32, %arg1: memref<16x128xf32, #tpu.memory_space<vmem>>, %arg2: memref<1x128xf32, #tpu.memory_space<vmem>>, %arg3: memref<1x128xf32, #tpu.memory_space<vmem>>, %arg4: memref<16x128xf32, #tpu.memory_space<vmem>>) attributes {dimension_semantics = [#tpu.dimension_semantics<parallel>], iteration_bounds = array<i64: 2>, scalar_prefetch = 0 : i64, scratch_operands = 0 : i64, tpu.core_type = #tpu.core_type<tc>, window_params = [{transform_indices = @transform_0, window_bounds = array<i64: 16, 128>}, {pipeline_mode = #tpu.pipeline_mode<synchronous>, transform_indices = @transform_1, window_bounds = array<i64: 1, 128>}, {pipeline_mode = #tpu.pipeline_mode<synchronous>, transform_indices = @transform_2, window_bounds = array<i64: 1, 128>}, {transform_indices = @transform_3, window_bounds = array<i64: 16, 128>}]} {
    %c0 = arith.constant 0 : index
    %c0_0 = arith.constant 0 : index
    %0 = vector.load %arg1[%c0, %c0_0] : memref<16x128xf32, #tpu.memory_space<vmem>>, vector<16x128xf32>
    %c0_1 = arith.constant 0 : index
    %c0_2 = arith.constant 0 : index
    %1 = vector.load %arg2[%c0_1, %c0_2] : memref<1x128xf32, #tpu.memory_space<vmem>>, vector<1x128xf32>
    %2 = vector.broadcast %1 : vector<1x128xf32> to vector<16x128xf32>
    %3 = arith.mulf %0, %2 : vector<16x128xf32>
    %c0_3 = arith.constant 0 : index
    %c0_4 = arith.constant 0 : index
    %4 = vector.load %arg3[%c0_3, %c0_4] : memref<1x128xf32, #tpu.memory_space<vmem>>, vector<1x128xf32>
    %5 = vector.broadcast %4 : vector<1x128xf32> to vector<16x128xf32>
    %6 = arith.addf %3, %5 : vector<16x128xf32>
    %cst = arith.constant 0.000000e+00 : f32
    %7 = vector.broadcast %cst : f32 to vector<16x128xf32>
    %8 = arith.cmpf ogt, %6, %7 : vector<16x128xf32>
    %cst_5 = arith.constant 0.00999999977 : f32
    %9 = vector.broadcast %cst_5 : f32 to vector<16x128xf32>
    %10 = arith.mulf %9, %6 : vector<16x128xf32>
    %11 = arith.select %8, %6, %10 : vector<16x128xi1>, vector<16x128xf32>
    %c0_6 = arith.constant 0 : index
    %c0_7 = arith.constant 0 : index
    %12 = vector.load %arg4[%c0_6, %c0_7] : memref<16x128xf32, #tpu.memory_space<vmem>>, vector<16x128xf32>
    tpu.vector_store %arg4[%c0_6, %c0_7], %11 {strides = array<i32>} : memref<16x128xf32, #tpu.memory_space<vmem>>, vector<16x128xf32>,
    return
  }
  func.func @transform_0(%arg0: i32) -> (i32, i32) {
    %c0_i32 = arith.constant 0 : i32
    %c0_i32_0 = arith.constant 0 : i32
    return %arg0, %c0_i32 : i32, i32
  }
  func.func @transform_1(%arg0: i32) -> (i32, i32) {
    %c0_i32 = arith.constant 0 : i32
    %c0_i32_0 = arith.constant 0 : i32
    %c0_i32_1 = arith.constant 0 : i32
    return %c0_i32, %c0_i32_0 : i32, i32
  }
  func.func @transform_2(%arg0: i32) -> (i32, i32) {
    %c0_i32 = arith.constant 0 : i32
    %c0_i32_0 = arith.constant 0 : i32
    %c0_i32_1 = arith.constant 0 : i32
    return %c0_i32, %c0_i32_0 : i32, i32
  }
  func.func @transform_3(%arg0: i32) -> (i32, i32) {
    %c0_i32 = arith.constant 0 : i32
    %c0_i32_0 = arith.constant 0 : i32
    return %arg0, %c0_i32 : i32, i32
  }
}

module attributes {stable_mosaic.version = 11 : i64} {
  func.func @conv3x3_kernel(%arg0: i32, %arg1: memref<1x16x128xf32, #tpu.memory_space<vmem>>, %arg2: memref<384x128xbf16, #tpu.memory_space<vmem>>, %arg3: memref<1x128xf32, #tpu.memory_space<vmem>>, %arg4: memref<1x128xf32, #tpu.memory_space<vmem>>, %arg5: memref<1x128xf32, #tpu.memory_space<vmem>>, %arg6: memref<1x16x128xf32, #tpu.memory_space<vmem>>, %arg7: memref<1x1x128xf32, #tpu.memory_space<vmem>>, %arg8: memref<1x1x128xf32, #tpu.memory_space<vmem>>) attributes {dimension_semantics = [#tpu.dimension_semantics<parallel>], iteration_bounds = array<i64: 2>, scalar_prefetch = 0 : i64, scratch_operands = 0 : i64, tpu.core_type = #tpu.core_type<tc>, window_params = [{transform_indices = @transform_0, window_bounds = array<i64: 1, 16, 128>}, {pipeline_mode = #tpu.pipeline_mode<synchronous>, transform_indices = @transform_1, window_bounds = array<i64: 384, 128>}, {pipeline_mode = #tpu.pipeline_mode<synchronous>, transform_indices = @transform_2, window_bounds = array<i64: 1, 128>}, {pipeline_mode = #tpu.pipeline_mode<synchronous>, transform_indices = @transform_3, window_bounds = array<i64: 1, 128>}, {pipeline_mode = #tpu.pipeline_mode<synchronous>, transform_indices = @transform_4, window_bounds = array<i64: 1, 128>}, {transform_indices = @transform_5, window_bounds = array<i64: 1, 16, 128>}, {transform_indices = @transform_6, window_bounds = array<i64: 1, 1, 128>}, {transform_indices = @transform_7, window_bounds = array<i64: 1, 1, 128>}]} {
    %0 = tpu.iota {dimensions = array<i32: 0>} : vector<16x128xi32>
    %c0 = arith.constant 0 : index
    %c0_0 = arith.constant 0 : index
    %c0_1 = arith.constant 0 : index
    %1 = vector.load %arg1[%c0, %c0_0, %c0_1] : memref<1x16x128xf32, #tpu.memory_space<vmem>>, vector<1x16x128xf32>
    %2 = vector.shape_cast %1 : vector<1x16x128xf32> to vector<16x128xf32>
    %c0_2 = arith.constant 0 : index
    %c0_3 = arith.constant 0 : index
    %3 = vector.load %arg4[%c0_2, %c0_3] : memref<1x128xf32, #tpu.memory_space<vmem>>, vector<1x128xf32>
    %4 = vector.broadcast %3 : vector<1x128xf32> to vector<16x128xf32>
    %5 = arith.mulf %2, %4 : vector<16x128xf32>
    %c0_4 = arith.constant 0 : index
    %c0_5 = arith.constant 0 : index
    %6 = vector.load %arg5[%c0_4, %c0_5] : memref<1x128xf32, #tpu.memory_space<vmem>>, vector<1x128xf32>
    %7 = vector.broadcast %6 : vector<1x128xf32> to vector<16x128xf32>
    %8 = arith.addf %5, %7 : vector<16x128xf32>
    %cst = arith.constant 0.000000e+00 : f32
    %9 = vector.broadcast %cst : f32 to vector<16x128xf32>
    %10 = arith.cmpf ogt, %8, %9 : vector<16x128xf32>
    %cst_6 = arith.constant 0.00999999977 : f32
    %11 = vector.broadcast %cst_6 : f32 to vector<16x128xf32>
    %12 = arith.mulf %11, %8 : vector<16x128xf32>
    %13 = arith.select %10, %8, %12 : vector<16x128xi1>, vector<16x128xf32>
    %c0_i32 = arith.constant 0 : i32
    %14 = vector.broadcast %c0_i32 : i32 to vector<16x128xi32>
    %15 = arith.cmpi eq, %0, %14 : vector<16x128xi32>
    %c1_i32 = arith.constant 1 : i32
    %16 = tpu.dynamic_rotate %13 by %c1_i32 dim 0 : vector<16x128xf32>, i32 -> vector<16x128xf32>
    %cst_7 = arith.constant 0.000000e+00 : f32
    %17 = vector.broadcast %cst_7 : f32 to vector<16x128xf32>
    %18 = arith.select %15, %17, %16 : vector<16x128xi1>, vector<16x128xf32>
    %c15_i32 = arith.constant 15 : i32
    %19 = vector.broadcast %c15_i32 : i32 to vector<16x128xi32>
    %20 = arith.cmpi eq, %0, %19 : vector<16x128xi32>
    %c15_i32_8 = arith.constant 15 : i32
    %21 = tpu.dynamic_rotate %13 by %c15_i32_8 dim 0 : vector<16x128xf32>, i32 -> vector<16x128xf32>
    %cst_9 = arith.constant 0.000000e+00 : f32
    %22 = vector.broadcast %cst_9 : f32 to vector<16x128xf32>
    %23 = arith.select %20, %22, %21 : vector<16x128xi1>, vector<16x128xf32>
    %24 = tpu.concatenate %18, %13, %23 in 1 : vector<16x128xf32>, vector<16x128xf32>, vector<16x128xf32> -> vector<16x384xf32>
    %25 = arith.truncf %24 : vector<16x384xf32> to vector<16x384xbf16>
    %c0_10 = arith.constant 0 : index
    %c0_11 = arith.constant 0 : index
    %26 = vector.load %arg2[%c0_10, %c0_11] : memref<384x128xbf16, #tpu.memory_space<vmem>>, vector<384x128xbf16>
    %cst_12 = arith.constant dense<0.000000e+00> : vector<16x128xf32>
    %27 = tpu.matmul %25, %26, %cst_12 {dimension_numbers = #tpu.dot_dimension_numbers<[1], [0], [0], [1], [0, 0, 1, 1], [], []>} : vector<16x384xbf16>, vector<384x128xbf16>, vector<16x128xf32> -> vector<16x128xf32>
    %cst_13 = arith.constant dense<0.000000e+00> : vector<128xf32>
    %28 = vector.multi_reduction <add>, %27, %cst_13 [0] : vector<16x128xf32> to vector<128xf32>
    %29 = vector.shape_cast %28 : vector<128xf32> to vector<1x128xf32>
    %c0_14 = arith.constant 0 : index
    %c0_15 = arith.constant 0 : index
    %c0_16 = arith.constant 0 : index
    %30 = vector.load %arg7[%c0_14, %c0_15, %c0_16] : memref<1x1x128xf32, #tpu.memory_space<vmem>>, vector<1x1x128xf32>
    %31 = vector.shape_cast %30 : vector<1x1x128xf32> to vector<1x128xf32>
    %32 = vector.shape_cast %29 : vector<1x128xf32> to vector<1x1x128xf32>
    tpu.vector_store %arg7[%c0_14, %c0_15, %c0_16], %32 {strides = array<i32>} : memref<1x1x128xf32, #tpu.memory_space<vmem>>, vector<1x1x128xf32>,
    %33 = arith.mulf %27, %27 : vector<16x128xf32>
    %cst_17 = arith.constant dense<0.000000e+00> : vector<128xf32>
    %34 = vector.multi_reduction <add>, %33, %cst_17 [0] : vector<16x128xf32> to vector<128xf32>
    %35 = vector.shape_cast %34 : vector<128xf32> to vector<1x128xf32>
    %c0_18 = arith.constant 0 : index
    %c0_19 = arith.constant 0 : index
    %c0_20 = arith.constant 0 : index
    %36 = vector.load %arg8[%c0_18, %c0_19, %c0_20] : memref<1x1x128xf32, #tpu.memory_space<vmem>>, vector<1x1x128xf32>
    %37 = vector.shape_cast %36 : vector<1x1x128xf32> to vector<1x128xf32>
    %38 = vector.shape_cast %35 : vector<1x128xf32> to vector<1x1x128xf32>
    tpu.vector_store %arg8[%c0_18, %c0_19, %c0_20], %38 {strides = array<i32>} : memref<1x1x128xf32, #tpu.memory_space<vmem>>, vector<1x1x128xf32>,
    %c0_21 = arith.constant 0 : index
    %c0_22 = arith.constant 0 : index
    %39 = vector.load %arg3[%c0_21, %c0_22] : memref<1x128xf32, #tpu.memory_space<vmem>>, vector<1x128xf32>
    %40 = vector.broadcast %39 : vector<1x128xf32> to vector<16x128xf32>
    %41 = arith.addf %27, %40 : vector<16x128xf32>
    %c0_23 = arith.constant 0 : index
    %c0_24 = arith.constant 0 : index
    %c0_25 = arith.constant 0 : index
    %42 = vector.load %arg6[%c0_23, %c0_24, %c0_25] : memref<1x16x128xf32, #tpu.memory_space<vmem>>, vector<1x16x128xf32>
    %43 = vector.shape_cast %42 : vector<1x16x128xf32> to vector<16x128xf32>
    %44 = vector.shape_cast %41 : vector<16x128xf32> to vector<1x16x128xf32>
    tpu.vector_store %arg6[%c0_23, %c0_24, %c0_25], %44 {strides = array<i32>} : memref<1x16x128xf32, #tpu.memory_space<vmem>>, vector<1x16x128xf32>,
    return
  }
  func.func @transform_0(%arg0: i32) -> (i32, i32, i32) {
    %c0_i32 = arith.constant 0 : i32
    %c0_i32_0 = arith.constant 0 : i32
    %c0_i32_1 = arith.constant 0 : i32
    return %arg0, %c0_i32, %c0_i32_0 : i32, i32, i32
  }
  func.func @transform_1(%arg0: i32) -> (i32, i32) {
    %c0_i32 = arith.constant 0 : i32
    %c0_i32_0 = arith.constant 0 : i32
    %c0_i32_1 = arith.constant 0 : i32
    return %c0_i32, %c0_i32_0 : i32, i32
  }
  func.func @transform_2(%arg0: i32) -> (i32, i32) {
    %c0_i32 = arith.constant 0 : i32
    %c0_i32_0 = arith.constant 0 : i32
    %c0_i32_1 = arith.constant 0 : i32
    return %c0_i32, %c0_i32_0 : i32, i32
  }
  func.func @transform_3(%arg0: i32) -> (i32, i32) {
    %c0_i32 = arith.constant 0 : i32
    %c0_i32_0 = arith.constant 0 : i32
    %c0_i32_1 = arith.constant 0 : i32
    return %c0_i32, %c0_i32_0 : i32, i32
  }
  func.func @transform_4(%arg0: i32) -> (i32, i32) {
    %c0_i32 = arith.constant 0 : i32
    %c0_i32_0 = arith.constant 0 : i32
    %c0_i32_1 = arith.constant 0 : i32
    return %c0_i32, %c0_i32_0 : i32, i32
  }
  func.func @transform_5(%arg0: i32) -> (i32, i32, i32) {
    %c0_i32 = arith.constant 0 : i32
    %c0_i32_0 = arith.constant 0 : i32
    %c0_i32_1 = arith.constant 0 : i32
    return %arg0, %c0_i32, %c0_i32_0 : i32, i32, i32
  }
  func.func @transform_6(%arg0: i32) -> (i32, i32, i32) {
    %c0_i32 = arith.constant 0 : i32
    %c0_i32_0 = arith.constant 0 : i32
    %c0_i32_1 = arith.constant 0 : i32
    return %arg0, %c0_i32, %c0_i32_0 : i32, i32, i32
  }
  func.func @transform_7(%arg0: i32) -> (i32, i32, i32) {
    %c0_i32 = arith.constant 0 : i32
    %c0_i32_0 = arith.constant 0 : i32
    %c0_i32_1 = arith.constant 0 : i32
    return %arg0, %c0_i32, %c0_i32_0 : i32, i32, i32
  }
}

</mosaic_0001>

<bundles_post_ra>
// kernel: tile.29
= control target key start
LH: loop header
LB: loop body
LE: loop exit
PB: predicated region body
PF: predicated region fallthrough
CT: control target
= control target key end

     0   :  { %s133_s10 = smov 120   ;;  %s134_s11 = smov 104   ;;  %vm3_vm0 = vcmask 64512   ;;  %vm9_vm1 = vcmask 1048512   ;;  %vm15_vm2 = vcmask 982912   ;;  %vm21_vm3 = vcmask 917312   ;;  %s209_s0 = inlined_call_operand.vmem [shape: f32[16,8], index: 0, kind: input, shape index: {}]   ;;  %s210_s1 = inlined_call_operand.vmem [shape: f32[1,128], index: 1, kind: output, shape index: {}]  }
   0x1   :  { %v103_v0 = vld [vmem:[%s209_s0 + $0xf] sm:$0x1]   ;;  %v105_v1 = vld [vmem:[%s209_s0 + $0xd] sm:$0x1]   ;;  %v104_v2 = vld [vmem:[%s209_s0 + $0xe] sm:$0x1]  }
   0x2   :  { %7 = vrot.lane.b32.xlu0 %v103_v0, %s133_s10  ;;  %19 = vrot.lane.b32.xlu1 %v105_v1, %s134_s11  ;;  %v106_v3 = vld [vmem:[%s209_s0 + $0xc] sm:$0x1]   ;;  %s135_s16 = smov 112   ;;  %s136_s17 = smov 96   ;;  %v107_v4 = vld [vmem:[%s209_s0 + $0xb] sm:$0x1]  }
   0x3   :  { %v108_v5 = vld [vmem:[%s209_s0 + $0xa] sm:$0x1]   ;;  %v2_v6 = vld [vmem:[%s209_s0] sm:$0x1]   ;;  %s137_s24 = smov 88   ;;  %s138_s25 = smov 80  }
   0x4   :  { %4 = vst.msk [vmem:[#allocation0] sm:$0x1] %vm3_vm0, %v2_v6   ;;  %v109_v7 = vld [vmem:[%s209_s0 + $0x9] sm:$0x1]   ;;  %v110_v8 = vld [vmem:[%s209_s0 + $0x8] sm:$0x1]  }
   0x5   :  { %s139_s30 = smov 72   ;;  %s140_s2 = smov 64   ;;  %v111_v9 = vld [vmem:[%s209_s0 + $0x7] sm:$0x1]   ;;  %v112_v10 = vld [vmem:[%s209_s0 + $0x6] sm:$0x1]  }
   0x6   :  { %13 = vrot.lane.b32.xlu0 %v104_v2, %s135_s16  ;;  %25 = vrot.lane.b32.xlu1 %v106_v3, %s136_s17  ;;  %s141_s7 = smov 56   ;;  %s142_s8 = smov 48   ;;  %v113_v11 = vld [vmem:[%s209_s0 + $0x5] sm:$0x1]   ;;  %v114_v12 = vld [vmem:[%s209_s0 + $0x4] sm:$0x1]  }
   0x7   :  { %s143_s13 = smov 40   ;;  %s144_s14 = smov 32   ;;  %v115_v13 = vld [vmem:[%s209_s0 + $0x3] sm:$0x1]   ;;  %v116_v14 = vld [vmem:[%s209_s0 + $0x2] sm:$0x1]  }
   0x8   :  { %s145_s19 = smov 24   ;;  %s146_s20 = smov 16   ;;  %v117_v15 = vld [vmem:[%s209_s0 + $0x1] sm:$0x1]   ;;  %vm27_vm4 = vcmask 851712   ;;  %vm33_vm5 = vcmask 786112  }
   0x9   :  { %s147_s0 = smov 8   ;;  %vm39_vm6 = vcmask 720512   ;;  %vm45_vm7 = vcmask 654912   ;;  %vm51_vm8 = vcmask 589312   ;;  %vm57_vm9 = vcmask 523712  }
   0xa   :  { %31 = vrot.lane.b32.xlu0 %v107_v4, %s137_s24  ;;  %37 = vrot.lane.b32.xlu1 %v108_v5, %s138_s25  ;;  %vm63_vm10 = vcmask 458112   ;;  %vm69_vm11 = vcmask 392512   ;;  %vm75_vm12 = vcmask 326912   ;;  %vm81_vm13 = vcmask 261312  }
   0xb   :  { %vm87_vm14 = vcmask 195712   ;;  %vm93_vm15 = vcmask 130112  }
   0xe   :  { %43 = vrot.lane.b32.xlu0 %v109_v7, %s139_s30  ;;  %49 = vrot.lane.b32.xlu1 %v110_v8, %s140_s2 }
  0x12   :  { %55 = vrot.lane.b32.xlu0 %v111_v9, %s141_s7  ;;  %61 = vrot.lane.b32.xlu1 %v112_v10, %s142_s8 }
  0x16   :  { %67 = vrot.lane.b32.xlu0 %v113_v11, %s143_s13  ;;  %73 = vrot.lane.b32.xlu1 %v114_v12, %s144_s14 }
  0x1a   :  { %79 = vrot.lane.b32.xlu0 %v115_v13, %s145_s19  ;;  %85 = vrot.lane.b32.xlu1 %v116_v14, %s146_s20 }
  0x1e   :  { %91 = vrot.lane.b32.xlu0 %v117_v15, %s147_s0 }
  0x74   :  { %v8_v16 = vpop.permute.xlu0 %7   ;;  %v20_v17 = vpop.permute.xlu1 %19  }
  0x75   :  { %10 = vst.msk [vmem:[#allocation0] sm:$0x1] %vm9_vm1, %v8_v16  }
  0x78   :  { %v14_v18 = vpop.permute.xlu0 %13   ;;  %v26_v19 = vpop.permute.xlu1 %25  }
  0x79   :  { %16 = vst.msk [vmem:[#allocation0] sm:$0x1] %vm15_vm2, %v14_v18  }
  0x7a   :  { %22 = vst.msk [vmem:[#allocation0] sm:$0x1] %vm21_vm3, %v20_v17  }
  0x7b   :  { %28 = vst.msk [vmem:[#allocation0] sm:$0x1] %vm27_vm4, %v26_v19  }
  0x7c   :  { %v32_v20 = vpop.permute.xlu0 %31   ;;  %v38_v21 = vpop.permute.xlu1 %37  }
  0x7d   :  { %34 = vst.msk [vmem:[#allocation0] sm:$0x1] %vm33_vm5, %v32_v20  }
  0x7e   :  { %40 = vst.msk [vmem:[#allocation0] sm:$0x1] %vm39_vm6, %v38_v21  }
  0x80   :  { %v44_v22 = vpop.permute.xlu0 %43   ;;  %v50_v23 = vpop.permute.xlu1 %49  }
  0x81   :  { %46 = vst.msk [vmem:[#allocation0] sm:$0x1] %vm45_vm7, %v44_v22  }
  0x82   :  { %52 = vst.msk [vmem:[#allocation0] sm:$0x1] %vm51_vm8, %v50_v23  }
  0x84   :  { %v56_v24 = vpop.permute.xlu0 %55   ;;  %v62_v25 = vpop.permute.xlu1 %61  }
  0x85   :  { %58 = vst.msk [vmem:[#allocation0] sm:$0x1] %vm57_vm9, %v56_v24  }
  0x86   :  { %64 = vst.msk [vmem:[#allocation0] sm:$0x1] %vm63_vm10, %v62_v25  }
  0x88   :  { %v68_v26 = vpop.permute.xlu0 %67   ;;  %v74_v27 = vpop.permute.xlu1 %73  }
  0x89   :  { %70 = vst.msk [vmem:[#allocation0] sm:$0x1] %vm69_vm11, %v68_v26  }
  0x8a   :  { %76 = vst.msk [vmem:[#allocation0] sm:$0x1] %vm75_vm12, %v74_v27  }
  0x8c   :  { %v80_v28 = vpop.permute.xlu0 %79   ;;  %v86_v29 = vpop.permute.xlu1 %85  }
  0x8d   :  { %82 = vst.msk [vmem:[#allocation0] sm:$0x1] %vm81_vm13, %v80_v28  }
  0x8e   :  { %88 = vst.msk [vmem:[#allocation0] sm:$0x1] %vm87_vm14, %v86_v29  }
  0x90   :  { %v92_v30 = vpop.permute.xlu0 %91  }
  0x91   :  { %94 = vst.msk [vmem:[#allocation0] sm:$0x1] %vm93_vm15, %v92_v30  }
  0x98   :  { %v99_v31 = vld [vmem:[#allocation0] sm:$0x1] }
  0x99   :  { %102 = vst [vmem:[%s210_s1] sm:$0x1] %v99_v31 }

// kernel: tile.28
= control target key start
LH: loop header
LB: loop body
LE: loop exit
PB: predicated region body
PF: predicated region fallthrough
CT: control target
= control target key end

     0   :  { %s28_s0 = inlined_call_operand.vmem [shape: f32[8], index: 0, kind: input, shape index: {}]   ;;  %s29_s1 = inlined_call_operand.vmem [shape: f32[16,8], index: 1, kind: output, shape index: {}]  }
   0x1   :  { %v4_v0 = vld [vmem:[%s28_s0] ss:$0 sm:$0xff] }
   0x2   :  { %5 = vst [vmem:[%s29_s1] sm:$0xff] %v4_v0  ;;  %8 = vst [vmem:[%s29_s1 + $0x8] sm:$0xff] %v4_v0 }

// kernel: upsample_bn_forward.5
= control target key start
LH: loop header
LB: loop body
LE: loop exit
PB: predicated region body
PF: predicated region fallthrough
CT: control target
= control target key end

     0   :  { %s307_s12 = smov 0   ;;  %s330_s0 = inlined_call_operand.vmem [shape: f32[32,128], index: 0, kind: input, shape index: {}]   ;;  %s331_s1 = inlined_call_operand.vmem [shape: f32[1,128], index: 1, kind: input, shape index: {}]   ;;  %s332_s2 = inlined_call_operand.vmem [shape: f32[1,128], index: 2, kind: input, shape index: {}]   ;;  %s333_s3 = inlined_call_operand.vmem [shape: f32[32,128], index: 3, kind: output, shape index: {}]  }
   0x1 LB: > { %s258_s13 = sadd.s32 4294967295, %s285_s12   ;;  %p262_p0 = scmp.ge.s32.totalorder %s285_s12, 1  ;;  %s285_s12 = sphi %s307_s12, %s13_s12  }
   0x2   : > { %p138_p1 = scmp.lt.s32.totalorder %s285_s12, 3 }
   0x4   : > { %p139_p2 = pnand %p262_p0, %p138_p1 }
   0x5   : > { %s263_s14 = sshll.u32 (!%p139_p2), %s258_s13, 1 }
   0x6   : > { %142 = sbr.rel (%p139_p2) target bundleno = 23 (0x17), region = 32  ;;  %p163_p3 = scmp.lt.s32.totalorder (!%p139_p2), %s263_s14, 3 }
   0xb   : > { %s335_s14 = smov (!%p163_p3, %s263_s14), 3  ;;  %v267_v0 = vld [vmem:[%s331_s1] ss:$0 sm:$0xff] }
   0xc   : > { %s264_s15 = sshll.u32 %s335_s14, 3  ;;  %v268_v3 = vld [vmem:[%s332_s2] ss:$0 sm:$0xff] }
   0xd   : > { %s166_s20 = scalar_lea.vmem %s330_s0, %s264_s15  ;;  %s172_s25 = scalar_lea.vmem %s333_s3, %s264_s15 }
   0xe   : > { %v174_v1 = vld [vmem:[%s166_s20] sm:$0xff]  ;;  %v175_v2 = vld [vmem:[%s166_s20 + $0x8] sm:$0xff] }
   0xf   : > { %v183_v4 = vmul.f32 %v267_v0, %v174_v1  ;;  %v184_v5 = vmul.f32 %v267_v0, %v175_v2 }
  0x11   : > { %v192_v6 = vadd.f32 %v268_v3, %v183_v4  ;;  %v193_v7 = vadd.f32 %v268_v3, %v184_v5 }
  0x13   : > { %vm194_vm0 = vcmp.gt.f32.partialorder %v192_v6, 0.0  ;;  %v196_v8 = vmul.f32 0.01, %v192_v6  ;;  %vm195_vm1 = vcmp.gt.f32.partialorder %v193_v7, 0.0  ;;  %v197_v9 = vmul.f32 0.01, %v193_v7 }
  0x15   : > { %v198_v10 = vsel %vm194_vm0, %v192_v6, %v196_v8  ;;  %v199_v11 = vsel %vm195_vm1, %v193_v7, %v197_v9 }
  0x16   : > { %200 = vst [vmem:[%s172_s25] sm:$0xff] %v198_v10  ;;  %201 = vst [vmem:[%s172_s25 + $0x8] sm:$0xff] %v199_v11 }
  0x17 PF: > { %s13_s12 = sadd.s32 1, %s285_s12  }
  0x18   : > { %p10_p4 = scmp.ge.s32.totalorder %s13_s12, 4  }
  0x1a   :  { %12 = sbr.rel (!%p10_p4) target bundleno = 1 (0x1), region = 62 }

// kernel: upsample_bn_forward.3
= control target key start
LH: loop header
LB: loop body
LE: loop exit
PB: predicated region body
PF: predicated region fallthrough
CT: control target
= control target key end

     0   :  { %s916_s24 = smov 0   ;;  %s1038_s0 = inlined_call_operand.vmem [shape: f32[2,16,128], index: 0, kind: input, shape index: {}]   ;;  %s1039_s1 = inlined_call_operand.vmem [shape: bf16[384,128], index: 1, kind: input, shape index: {}]   ;;  %s1040_s2 = inlined_call_operand.vmem [shape: f32[1,128], index: 2, kind: input, shape index: {}]   ;;  %s1041_s3 = inlined_call_operand.vmem [shape: f32[1,128], index: 3, kind: input, shape index: {}]   ;;  %s1042_s4 = inlined_call_operand.vmem [shape: f32[1,128], index: 4, kind: input, shape index: {}]   ;;  %s1043_s5 = inlined_call_operand.vmem [shape: f32[2,16,128], index: 5, kind: output, shape index: {0}]   ;;  %s1044_s6 = inlined_call_operand.vmem [shape: f32[2,1,128], index: 6, kind: output, shape index: {1}]   ;;  %s1045_s7 = inlined_call_operand.vmem [shape: f32[2,1,128], index: 7, kind: output, shape index: {2}]  }
   0x1 LB: > { %s731_s3 = sadd.s32 4294967295, %s871_s24   ;;  %p735_p0 = scmp.ge.s32.totalorder %s871_s24, 1  ;;  %s871_s24 = sphi %s916_s24, %s18_s24  }
   0x2   : > { %p242_p1 = scmp.lt.s32.totalorder %s871_s24, 3 }
   0x4   : > { %p243_p2 = pnand %p735_p0, %p242_p1 }
   0x5   : > { %p280_p3 = scmp.lt.s32.totalorder (!%p243_p2), %s731_s3, 1 }
   0x6   : > { %246 = sbr.rel (%p243_p2) target bundleno = 265 (0x109), region = 40 }
   0xb   : > { %v841_v0 = vld [vmem:[%s1039_s1 + $0x78] sm:$0xff]   ;;  %v873_v1 = vmov 0.0   ;;  %vm874_vm0 = vmmov 0   ;;  %v844_v4 = vld [vmem:[%s1039_s1 + $0x70] sm:$0xff]   ;;  %v847_v7 = vld [vmem:[%s1039_s1 + $0x68] sm:$0xff]   ;;  %s1047_s3 = smov (!%p280_p3, %s731_s3), 1  ;;  %v297_v16 = vlaneseq }
   0xc   : > { %810 = vmatprep.subr.bf16.mxu1 %v873_v1  ;;  %v842_v2 = vld [vmem:[%s1039_s1 + $0xb8] sm:$0xff]   ;;  %779 = vmatprep.subr.bf16.mxu0 %v841_v0  ;;  %v845_v5 = vld [vmem:[%s1039_s1 + $0xb0] sm:$0xff]   ;;  %v848_v8 = vld [vmem:[%s1039_s1 + $0xa8] sm:$0xff]   ;;  %s775_s10 = sshll.u32 %s1047_s3, 4  ;;  %vm875_vm5 = vmmov 1   ;;  %s292_s14 = scalar_lea.vmem %s1044_s6, %s1047_s3 }
   0xd   : > { %v843_v3 = vld [vmem:[%s1039_s1 + $0x38] sm:$0xff]   ;;  %826 = vmatprep.mubr.msk.bf16.mxu1 %vm874_vm0, %v873_v1  ;;  %811 = vmatpush3.bf16.msra.mxu1 %v842_v2  ;;  %v846_v6 = vld [vmem:[%s1039_s1 + $0x30] sm:$0xff]   ;;  %v849_v9 = vld [vmem:[%s1039_s1 + $0x28] sm:$0xff]   ;;  %v298_v20 = vshrl.u32 %v297_v16, 7  ;;  %s284_s19 = scalar_lea.vmem %s1038_s0, %s775_s10  ;;  %s289_s12 = scalar_lea.vmem %s1043_s5, %s775_s10 }
   0xe   : > { %780 = vmatpush3.bf16.msra.mxu0 %v843_v3  ;;  %812 = vmatprep.subr.bf16.mxu1 %v873_v1  ;;  %v850_v10 = vld [vmem:[%s1039_s1 + $0x60] sm:$0xff]   ;;  %v853_v13 = vld [vmem:[%s1039_s1 + $0x58] sm:$0xff]   ;;  %v856_v17 = vld [vmem:[%s1039_s1 + $0x50] sm:$0xff]   ;;  %s295_s17 = scalar_lea.vmem %s1045_s7, %s1047_s3 }
   0xf   : > { %781 = vmatprep.subr.bf16.mxu0 %v844_v4  ;;  %v851_v11 = vld [vmem:[%s1039_s1 + $0xa0] sm:$0xff]   ;;  %v854_v14 = vld [vmem:[%s1039_s1 + $0x98] sm:$0xff]   ;;  %v857_v18 = vld [vmem:[%s1039_s1 + $0x90] sm:$0xff]   ;;  %v299_v26 = vadd.s32 8, %v298_v20  ;;  %vm315_vm1 = vcmp.lt.s32.totalorder %v298_v20, 7  ;;  %vm306_vm2 = vcmp.lt.s32.totalorder %v298_v20, 1 }
  0x10   : > { %v852_v12 = vld [vmem:[%s1039_s1 + $0x20] sm:$0xff]   ;;  %v855_v15 = vld [vmem:[%s1039_s1 + $0x18] sm:$0xff]   ;;  %v858_v19 = vld [vmem:[%s1039_s1 + $0x10] sm:$0xff]   ;;  %vm777_vm4 = vcmp.ne.s32.totalorder %v298_v20, 0 }
  0x11   : > { %813 = vmatpush3.bf16.msra.mxu1 %v845_v5  ;;  %v859_v21 = vld [vmem:[%s1039_s1 + $0x48] sm:$0xff]   ;;  %v300_v24 = vld [vmem:[%s284_s19] sm:$0xff]  ;;  %vm778_vm3 = vcmp.ne.s32.totalorder %v299_v26, 15  ;;  %vm765_vm7 = vmpackc.low %vm875_vm5, %vm777_vm4 }
  0x12   : > { %782 = vmatpush3.bf16.msra.mxu0 %v846_v6  ;;  %814 = vmatprep.subr.bf16.mxu1 %v873_v1  ;;  %v860_v22 = vld [vmem:[%s1039_s1 + $0x88] sm:$0xff]   ;;  %v862_v27 = vld [vmem:[%s1039_s1 + $0x40] sm:$0xff]   ;;  %v304_v28 = vrot.slane %v300_v24, 7  ;;  %v313_v30 = vrot.slane %v300_v24, 1  ;;  %vm769_vm6 = vmpackc.low %vm778_vm3, %vm875_vm5 }
  0x13   : > { %783 = vmatprep.subr.bf16.mxu0 %v847_v7  ;;  %v861_v23 = vld [vmem:[%s1039_s1 + $0x8] sm:$0xff]   ;;  %v863_v33 = vld [vmem:[%s1039_s1 + $0x80] sm:$0xff]  }
  0x14   : > { %v301_v25 = vld [vmem:[%s284_s19 + $0x8] sm:$0xff]  ;;  %v864_v36 = vld [vmem:[%s1039_s1] sm:$0xff]  }
  0x15   : > { %815 = vmatpush3.bf16.msra.mxu1 %v848_v8  ;;  %v305_v29 = vrot.slane %v301_v25, 7  ;;  %v314_v31 = vrot.slane %v301_v25, 1  ;;  %v321_v32 = vpack.c.bf16 %v301_v25, %v300_v24  ;;  %v772_v47 = vld [vmem:[%s1040_s2] ss:$0 sm:$0xff] }
  0x16   : > { %784 = vmatpush3.bf16.msra.mxu0 %v849_v9  ;;  %816 = vmatprep.subr.bf16.mxu1 %v873_v1 }
  0x17   : > { %785 = vmatprep.subr.bf16.mxu0 %v850_v10  ;;  %v316_v34 = vsel %vm315_vm1, %v313_v30, %v314_v31  ;;  %v317_v35 = vsel %vm315_vm1, %v314_v31, %v313_v30  ;;  %v307_v37 = vsel %vm306_vm2, %v304_v28, %v305_v29  ;;  %v308_v38 = vsel %vm306_vm2, %v305_v29, %v304_v28 }
  0x18   : > { %547 = vmatprep.mubr.bf16.mxu0 %v321_v32  ;;  %v770_v39 = vpack.c.bf16 %v317_v35, %v316_v34  ;;  %v766_v40 = vpack.c.bf16 %v307_v37, %v308_v38 }
  0x19   : > { %817 = vmatpush3.bf16.msra.mxu1 %v851_v11 }
  0x1a   : > { %786 = vmatpush3.bf16.msra.mxu0 %v852_v12  ;;  %818 = vmatprep.subr.bf16.mxu1 %v873_v1 }
  0x1b   : > { %787 = vmatprep.subr.bf16.mxu0 %v853_v13 }
  0x1d   : > { %819 = vmatpush3.bf16.msra.mxu1 %v854_v14 }
  0x1e   : > { %788 = vmatpush3.bf16.msra.mxu0 %v855_v15  ;;  %820 = vmatprep.subr.bf16.mxu1 %v873_v1 }
  0x1f   : > { %789 = vmatprep.subr.bf16.mxu0 %v856_v17 }
  0x21   : > { %821 = vmatpush3.bf16.msra.mxu1 %v857_v18 }
  0x22   : > { %790 = vmatpush3.bf16.msra.mxu0 %v858_v19  ;;  %822 = vmatprep.subr.bf16.mxu1 %v873_v1 }
  0x23   : > { %791 = vmatprep.subr.bf16.mxu0 %v859_v21 }
  0x25   : > { %823 = vmatpush3.bf16.msra.mxu1 %v860_v22 }
  0x26   : > { %792 = vmatpush3.bf16.msra.mxu0 %v861_v23  ;;  %824 = vmatprep.subr.bf16.mxu1 %v873_v1 }
  0x27   : > { %793 = vmatprep.subr.bf16.mxu0 %v862_v27 }
  0x29   : > { %825 = vmatpush3.bf16.msra.mxu1 %v863_v33 }
  0x2a   : > { %794 = vmatpush3.bf16.msra.mxu0 %v864_v36 }
  0x2c   : > { %827 = vmatmul.mubr.msk.bf16.vlgmr.msra.gmra.mxu1 %vm769_vm6, %v770_v39 }
  0x2d   : > { %767 = vmatmul.mubr.msk.bf16.vlgmr.msra.gmra.mxu0 %vm765_vm7, %v766_v40 }
  0xec   : > { %v590_v41 = vpop.f32.mrf.mxu1 }
  0xed   : > { %v795_v42 = vpop.f32.mrf.mxu0 }
  0xee   : > { %v828_v43 = vpop.f32.mrf.mxu1 }
  0xef   : > { %v796_v44 = vpop.f32.mrf.mxu0 }
  0xf0   : > { %v797_v45 = vadd.f32 %v796_v44, %v795_v42  ;;  %v593_v46 = vpop.f32.mrf.mxu1 }
  0xf1   : > { %v798_v48 = vpop.f32.mrf.mxu0 }
  0xf2   : > { %v591_v49 = vadd.f32 %v797_v45, %v590_v41  ;;  %v829_v50 = vpop.f32.mrf.mxu1 }
  0xf3   : > { %v799_v51 = vpop.f32.mrf.mxu0 }
  0xf4   : > { %v622_v52 = vadd.f32 %v772_v47, %v591_v49  ;;  %v800_v53 = vadd.f32 %v799_v51, %v798_v48  ;;  %v605_v55 = vmul.f32 %v591_v49, %v591_v49 }
  0xf6   : > { %624 = vst [vmem:[%s289_s12] sm:$0xff] %v622_v52  ;;  %v594_v54 = vadd.f32 %v800_v53, %v593_v46 }
  0xf8   : > { %v597_v56 = vadd.f32 %v594_v54, %v591_v49  ;;  %v606_v57 = vmul.f32 %v594_v54, %v594_v54  ;;  %v623_v58 = vadd.f32 %v772_v47, %v594_v54 }
  0xfa   : > { %v598_v59 = vrot.slane %v597_v56, 4  ;;  %v607_v60 = vadd.f32 %v606_v57, %v605_v55  ;;  %625 = vst [vmem:[%s289_s12 + $0x8] sm:$0xff] %v623_v58 }
  0xfc   : > { %v599_v61 = vadd.f32 %v598_v59, %v597_v56  ;;  %v608_v62 = vrot.slane %v607_v60, 4 }
  0xfe   : > { %v600_v63 = vrot.slane %v599_v61, 2  ;;  %v609_v0 = vadd.f32 %v608_v62, %v607_v60 }
 0x100   : > { %v601_v1 = vadd.f32 %v600_v63, %v599_v61  ;;  %v610_v2 = vrot.slane %v609_v0, 2 }
 0x102   : > { %v602_v3 = vrot.slane %v601_v1, 1  ;;  %v611_v4 = vadd.f32 %v610_v2, %v609_v0 }
 0x104   : > { %v603_v5 = vadd.f32 %v602_v3, %v601_v1  ;;  %v612_v6 = vrot.slane %v611_v4, 1 }
 0x106   : > { %604 = vst [vmem:[%s292_s14] sm:$0x1] %v603_v5  ;;  %v613_v7 = vadd.f32 %v612_v6, %v611_v4 }
 0x108   : > { %614 = vst [vmem:[%s295_s17] sm:$0x1] %v613_v7 }
 0x109 PF: > { %s18_s24 = sadd.s32 1, %s871_s24  }
 0x10a   : > { %p15_p4 = scmp.ge.s32.totalorder %s18_s24, 4  }
 0x10c   :  { %17 = sbr.rel (!%p15_p4) target bundleno = 1 (0x1), region = 94 }

// kernel: upsample_bn_forward.4
= control target key start
LH: loop header
LB: loop body
LE: loop exit
PB: predicated region body
PF: predicated region fallthrough
CT: control target
= control target key end

     0   :  { %s942_s24 = smov 0   ;;  %s1070_s0 = inlined_call_operand.vmem [shape: f32[2,16,128], index: 0, kind: input, shape index: {}]   ;;  %s1071_s1 = inlined_call_operand.vmem [shape: bf16[384,128], index: 1, kind: input, shape index: {}]   ;;  %s1072_s2 = inlined_call_operand.vmem [shape: f32[1,128], index: 2, kind: input, shape index: {}]   ;;  %s1073_s3 = inlined_call_operand.vmem [shape: f32[1,128], index: 3, kind: input, shape index: {}]   ;;  %s1074_s4 = inlined_call_operand.vmem [shape: f32[1,128], index: 4, kind: input, shape index: {}]   ;;  %s1075_s5 = inlined_call_operand.vmem [shape: f32[2,16,128], index: 5, kind: output, shape index: {0}]   ;;  %s1076_s6 = inlined_call_operand.vmem [shape: f32[2,1,128], index: 6, kind: output, shape index: {1}]   ;;  %s1077_s7 = inlined_call_operand.vmem [shape: f32[2,1,128], index: 7, kind: output, shape index: {2}]  }
   0x1 LB: > { %s755_s25 = sadd.s32 4294967295, %s897_s24   ;;  %p759_p0 = scmp.ge.s32.totalorder %s897_s24, 1  ;;  %s897_s24 = sphi %s942_s24, %s18_s24  }
   0x2   : > { %p242_p1 = scmp.lt.s32.totalorder %s897_s24, 3 }
   0x4   : > { %p243_p2 = pnand %p759_p0, %p242_p1 }
   0x5   : > { %p280_p3 = scmp.lt.s32.totalorder (!%p243_p2), %s755_s25, 1 }
   0x6   : > { %246 = sbr.rel (%p243_p2) target bundleno = 265 (0x109), region = 40 }
   0xb   : > { %v867_v0 = vld [vmem:[%s1071_s1 + $0x78] sm:$0xff]   ;;  %v899_v1 = vmov 0.0   ;;  %vm900_vm0 = vmmov 0   ;;  %v870_v4 = vld [vmem:[%s1071_s1 + $0x70] sm:$0xff]   ;;  %v873_v7 = vld [vmem:[%s1071_s1 + $0x68] sm:$0xff]   ;;  %s1079_s25 = smov (!%p280_p3, %s755_s25), 1  ;;  %v297_v17 = vlaneseq }
   0xc   : > { %836 = vmatprep.subr.bf16.mxu1 %v899_v1  ;;  %v868_v2 = vld [vmem:[%s1071_s1 + $0xb8] sm:$0xff]   ;;  %805 = vmatprep.subr.bf16.mxu0 %v867_v0  ;;  %v871_v5 = vld [vmem:[%s1071_s1 + $0xb0] sm:$0xff]   ;;  %v874_v8 = vld [vmem:[%s1071_s1 + $0xa8] sm:$0xff]   ;;  %s801_s14 = sshll.u32 %s1079_s25, 4  ;;  %vm901_vm7 = vmmov 1   ;;  %s292_s26 = scalar_lea.vmem %s1076_s6, %s1079_s25 }
   0xd   : > { %v869_v3 = vld [vmem:[%s1071_s1 + $0x38] sm:$0xff]   ;;  %852 = vmatprep.mubr.msk.bf16.mxu1 %vm900_vm0, %v899_v1  ;;  %837 = vmatpush3.bf16.msra.mxu1 %v868_v2  ;;  %v872_v6 = vld [vmem:[%s1071_s1 + $0x30] sm:$0xff]   ;;  %v875_v9 = vld [vmem:[%s1071_s1 + $0x28] sm:$0xff]   ;;  %s284_s23 = scalar_lea.vmem %s1070_s0, %s801_s14  ;;  %v298_v22 = vshrl.u32 %v297_v17, 7  ;;  %s289_s22 = scalar_lea.vmem %s1075_s5, %s801_s14 }
   0xe   : > { %806 = vmatpush3.bf16.msra.mxu0 %v869_v3  ;;  %838 = vmatprep.subr.bf16.mxu1 %v899_v1  ;;  %v876_v10 = vld [vmem:[%s1071_s1 + $0x60] sm:$0xff]   ;;  %v879_v13 = vld [vmem:[%s1071_s1 + $0x58] sm:$0xff]   ;;  %v882_v16 = vld [vmem:[%s1071_s1 + $0x50] sm:$0xff]   ;;  %s295_s29 = scalar_lea.vmem %s1077_s7, %s1079_s25 }
   0xf   : > { %807 = vmatprep.subr.bf16.mxu0 %v870_v4  ;;  %v877_v11 = vld [vmem:[%s1071_s1 + $0xa0] sm:$0xff]   ;;  %v880_v14 = vld [vmem:[%s1071_s1 + $0x98] sm:$0xff]   ;;  %v883_v18 = vld [vmem:[%s1071_s1 + $0x90] sm:$0xff]   ;;  %v299_v31 = vadd.s32 8, %v298_v22  ;;  %vm339_vm3 = vcmp.lt.s32.totalorder %v298_v22, 7  ;;  %vm330_vm5 = vcmp.lt.s32.totalorder %v298_v22, 1 }
  0x10   : > { %v878_v12 = vld [vmem:[%s1071_s1 + $0x20] sm:$0xff]   ;;  %v881_v15 = vld [vmem:[%s1071_s1 + $0x18] sm:$0xff]   ;;  %v884_v19 = vld [vmem:[%s1071_s1 + $0x10] sm:$0xff]   ;;  %vm803_vm6 = vcmp.ne.s32.totalorder %v298_v22, 0 }
  0x11   : > { %839 = vmatpush3.bf16.msra.mxu1 %v871_v5  ;;  %v885_v20 = vld [vmem:[%s1071_s1 + $0x48] sm:$0xff]   ;;  %v300_v24 = vld [vmem:[%s284_s23] sm:$0xff]  ;;  %vm804_vm4 = vcmp.ne.s32.totalorder %v299_v31, 15  ;;  %vm791_vm9 = vmpackc.low %vm901_vm7, %vm803_vm6 }
  0x12   : > { %808 = vmatpush3.bf16.msra.mxu0 %v872_v6  ;;  %840 = vmatprep.subr.bf16.mxu1 %v899_v1  ;;  %v886_v21 = vld [vmem:[%s1071_s1 + $0x88] sm:$0xff]   ;;  %v764_v26 = vld [vmem:[%s1073_s3] ss:$0 sm:$0xff]  ;;  %vm795_vm8 = vmpackc.low %vm804_vm4, %vm901_vm7 }
  0x13   : > { %809 = vmatprep.subr.bf16.mxu0 %v873_v7  ;;  %v887_v23 = vld [vmem:[%s1071_s1 + $0x8] sm:$0xff]   ;;  %v888_v27 = vld [vmem:[%s1071_s1 + $0x40] sm:$0xff]   ;;  %v309_v28 = vmul.f32 %v764_v26, %v300_v24 }
  0x14   : > { %v301_v25 = vld [vmem:[%s284_s23 + $0x8] sm:$0xff]  ;;  %v765_v30 = vld [vmem:[%s1074_s4] ss:$0 sm:$0xff] }
  0x15   : > { %841 = vmatpush3.bf16.msra.mxu1 %v874_v8  ;;  %v310_v29 = vmul.f32 %v764_v26, %v301_v25  ;;  %v889_v32 = vld [vmem:[%s1071_s1 + $0x80] sm:$0xff]   ;;  %v318_v33 = vadd.f32 %v765_v30, %v309_v28 }
  0x16   : > { %810 = vmatpush3.bf16.msra.mxu0 %v875_v9  ;;  %842 = vmatprep.subr.bf16.mxu1 %v899_v1  ;;  %v890_v35 = vld [vmem:[%s1071_s1] sm:$0xff]  }
  0x17   : > { %811 = vmatprep.subr.bf16.mxu0 %v876_v10  ;;  %v319_v34 = vadd.f32 %v765_v30, %v310_v29  ;;  %vm320_vm1 = vcmp.gt.f32.partialorder %v318_v33, 0.0  ;;  %v322_v36 = vmul.f32 0.01, %v318_v33  ;;  %v798_v56 = vld [vmem:[%s1072_s2] ss:$0 sm:$0xff] }
  0x19   : > { %843 = vmatpush3.bf16.msra.mxu1 %v877_v11  ;;  %vm321_vm2 = vcmp.gt.f32.partialorder %v319_v34, 0.0  ;;  %v323_v37 = vmul.f32 0.01, %v319_v34  ;;  %v324_v38 = vsel %vm320_vm1, %v318_v33, %v322_v36 }
  0x1a   : > { %812 = vmatpush3.bf16.msra.mxu0 %v878_v12  ;;  %844 = vmatprep.subr.bf16.mxu1 %v899_v1  ;;  %v328_v40 = vrot.slane %v324_v38, 7  ;;  %v337_v42 = vrot.slane %v324_v38, 1 }
  0x1b   : > { %813 = vmatprep.subr.bf16.mxu0 %v879_v13  ;;  %v325_v39 = vsel %vm321_vm2, %v319_v34, %v323_v37 }
  0x1c   : > { %v329_v41 = vrot.slane %v325_v39, 7  ;;  %v338_v43 = vrot.slane %v325_v39, 1  ;;  %v345_v44 = vpack.c.bf16 %v325_v39, %v324_v38 }
  0x1d   : > { %845 = vmatpush3.bf16.msra.mxu1 %v880_v14 }
  0x1e   : > { %814 = vmatpush3.bf16.msra.mxu0 %v881_v15  ;;  %846 = vmatprep.subr.bf16.mxu1 %v899_v1  ;;  %v340_v45 = vsel %vm339_vm3, %v337_v42, %v338_v43  ;;  %v341_v46 = vsel %vm339_vm3, %v338_v43, %v337_v42  ;;  %v331_v47 = vsel %vm330_vm5, %v328_v40, %v329_v41 }
  0x1f   : > { %815 = vmatprep.subr.bf16.mxu0 %v882_v16  ;;  %v332_v48 = vsel %vm330_vm5, %v329_v41, %v328_v40  ;;  %571 = vmatprep.mubr.bf16.mxu0 %v345_v44  ;;  %v796_v49 = vpack.c.bf16 %v341_v46, %v340_v45 }
  0x20   : > { %v792_v50 = vpack.c.bf16 %v331_v47, %v332_v48 }
  0x21   : > { %847 = vmatpush3.bf16.msra.mxu1 %v883_v18 }
  0x22   : > { %816 = vmatpush3.bf16.msra.mxu0 %v884_v19  ;;  %848 = vmatprep.subr.bf16.mxu1 %v899_v1 }
  0x23   : > { %817 = vmatprep.subr.bf16.mxu0 %v885_v20 }
  0x25   : > { %849 = vmatpush3.bf16.msra.mxu1 %v886_v21 }
  0x26   : > { %818 = vmatpush3.bf16.msra.mxu0 %v887_v23  ;;  %850 = vmatprep.subr.bf16.mxu1 %v899_v1 }
  0x27   : > { %819 = vmatprep.subr.bf16.mxu0 %v888_v27 }
  0x29   : > { %851 = vmatpush3.bf16.msra.mxu1 %v889_v32 }
  0x2a   : > { %820 = vmatpush3.bf16.msra.mxu0 %v890_v35 }
  0x2c   : > { %853 = vmatmul.mubr.msk.bf16.vlgmr.msra.gmra.mxu1 %vm795_vm8, %v796_v49 }
  0x2d   : > { %793 = vmatmul.mubr.msk.bf16.vlgmr.msra.gmra.mxu0 %vm791_vm9, %v792_v50 }
  0xec   : > { %v614_v51 = vpop.f32.mrf.mxu1 }
  0xed   : > { %v821_v52 = vpop.f32.mrf.mxu0 }
  0xee   : > { %v854_v53 = vpop.f32.mrf.mxu1 }
  0xef   : > { %v822_v54 = vpop.f32.mrf.mxu0 }
  0xf0   : > { %v823_v55 = vadd.f32 %v822_v54, %v821_v52  ;;  %v617_v57 = vpop.f32.mrf.mxu1 }
  0xf1   : > { %v824_v58 = vpop.f32.mrf.mxu0 }
  0xf2   : > { %v615_v59 = vadd.f32 %v823_v55, %v614_v51  ;;  %v855_v60 = vpop.f32.mrf.mxu1 }
  0xf3   : > { %v825_v61 = vpop.f32.mrf.mxu0 }
  0xf4   : > { %v646_v62 = vadd.f32 %v798_v56, %v615_v59  ;;  %v826_v63 = vadd.f32 %v825_v61, %v824_v58  ;;  %v629_v1 = vmul.f32 %v615_v59, %v615_v59 }
  0xf6   : > { %648 = vst [vmem:[%s289_s22] sm:$0xff] %v646_v62  ;;  %v618_v0 = vadd.f32 %v826_v63, %v617_v57 }
  0xf8   : > { %v621_v2 = vadd.f32 %v618_v0, %v615_v59  ;;  %v630_v3 = vmul.f32 %v618_v0, %v618_v0  ;;  %v647_v4 = vadd.f32 %v798_v56, %v618_v0 }
  0xfa   : > { %v622_v5 = vrot.slane %v621_v2, 4  ;;  %v631_v6 = vadd.f32 %v630_v3, %v629_v1  ;;  %649 = vst [vmem:[%s289_s22 + $0x8] sm:$0xff] %v647_v4 }
  0xfc   : > { %v623_v7 = vadd.f32 %v622_v5, %v621_v2  ;;  %v632_v8 = vrot.slane %v631_v6, 4 }
  0xfe   : > { %v624_v9 = vrot.slane %v623_v7, 2  ;;  %v633_v10 = vadd.f32 %v632_v8, %v631_v6 }
 0x100   : > { %v625_v11 = vadd.f32 %v624_v9, %v623_v7  ;;  %v634_v12 = vrot.slane %v633_v10, 2 }
 0x102   : > { %v626_v13 = vrot.slane %v625_v11, 1  ;;  %v635_v14 = vadd.f32 %v634_v12, %v633_v10 }
 0x104   : > { %v627_v15 = vadd.f32 %v626_v13, %v625_v11  ;;  %v636_v16 = vrot.slane %v635_v14, 1 }
 0x106   : > { %628 = vst [vmem:[%s292_s26] sm:$0x1] %v627_v15  ;;  %v637_v17 = vadd.f32 %v636_v16, %v635_v14 }
 0x108   : > { %638 = vst [vmem:[%s295_s29] sm:$0x1] %v637_v17 }
 0x109 PF: > { %s18_s24 = sadd.s32 1, %s897_s24  }
 0x10a   : > { %p15_p4 = scmp.ge.s32.totalorder %s18_s24, 4  }
 0x10c   :  { %17 = sbr.rel (!%p15_p4) target bundleno = 1 (0x1), region = 94 }

</bundles_post_ra>
